<compile_context>
chip_gen: v6e
topology: v6e:2x2x1
jax: 0.10.0
libtpu: 0.0.40
codegen_flags: <defaults>
</compile_context>

<pallas_src>
import functools
from math import pi

import numpy as np
import jax
import jax.numpy as jnp
from jax import lax
from jax.experimental import pallas as pl
from jax.experimental.pallas import tpu as pltpu

_SUB = 8      # sublanes per vreg
_LANE = 128   # lanes per vreg


def _round_up(x: int, m: int) -> int:
    return ((x + m - 1) // m) * m


def _cdiv(a: int, b: int) -> int:
    return (a + b - 1) // b


def _pow_static(x, p):
    """x ** p with p known at trace time.

    Integer p >= 1 is specialized to an exact multiply chain (exponentiation by
    squaring) so it runs on the 4-wide VALU instead of exp/log on the EUP.
    """
    if float(p) == int(p) and int(p) >= 1:
        e = int(p)
        result = None
        base = x
        while e:
            if e & 1:
                result = base if result is None else result * base
            e >>= 1
            if e:
                base = base * base
        return result
    return x ** p  # non-integer exponent fallback (EUP exp/log)


def _scaled_dist_and_prefactor(dist, *, inv_cutoff, norm_const, apply_smooth,
                               p, a, b, c):
    """Returns (d_scaled, prefactor), both shaped like `dist`.

    prefactor = norm_const * smooth_cutoff(d) / d  (all VALU, one divide)
    """
    r = dist * inv_cutoff                                    # d_scaled
    if apply_smooth:
        r_p = _pow_static(r, p)
        env = 1.0 + a * r_p + b * (r_p * r) + c * (r_p * r * r)
        smooth = jnp.where(r < 1.0, env, jnp.zeros_like(r))
        prefactor = (norm_const * smooth) / dist
    else:
        prefactor = norm_const / dist
    return r, prefactor


def _rbf_kernel_harmonic(dist_ref, out_ref, *, num_radial, chunk, inv_cutoff,
                         norm_const, apply_smooth, p, a, b, c):
    """Default-frequency path: freq_k = k * pi, via the sin recurrence.

    dist_ref: (8, TL)      distances, sublane+lane dense
    out_ref:  (R, 8, TL)   radial index leading, distances on sublanes/lanes
    """
    tl = dist_ref.shape[1]
    n_chunks = tl // chunk

    def body(j, carry):
        j0 = pl.multiple_of(j * chunk, chunk)
        d = dist_ref[:, pl.ds(j0, chunk)]                    # (8, CH)
        r, prefactor = _scaled_dist_and_prefactor(
            d, inv_cutoff=inv_cutoff, norm_const=norm_const,
            apply_smooth=apply_smooth, p=p, a=a, b=b, c=c)

        x = r * pi                                           # (8, CH)
        s_prev = jnp.zeros_like(x)                           # sin(0 * x)
        s_curr = jnp.sin(x)                                  # sin(1 * x)
        two_cos = 2.0 * jnp.cos(x)

        for k in range(num_radial):                          # static unroll (small R)
            if k > 0 and (k % 16) == 0:
                # Re-seed the Chebyshev recurrence to bound error for large R.
                s_curr = jnp.sin((k + 1.0) * x)
                s_prev = jnp.sin(float(k) * x)
            out_ref[k, :, pl.ds(j0, chunk)] = (
                prefactor * s_curr).astype(out_ref.dtype)    # direct row store
            if k + 1 < num_radial:
                s_next = two_cos * s_curr - s_prev
                s_prev, s_curr = s_curr, s_next
        return carry

    lax.fori_loop(0, n_chunks, body, jnp.int32(0))


def _rbf_kernel_general(dist_ref, freq_ref, out_ref, *, num_radial, chunk,
                        inv_cutoff, norm_const, apply_smooth, p, a, b, c):
    """General path (arbitrary / learnable frequencies).

    dist_ref: (8, TL)          distances
    freq_ref: (R,)  in SMEM    per-radial frequency scalars
    out_ref:  (R, 8, TL)
    """
    tl = dist_ref.shape[1]
    n_chunks = tl // chunk

    def body(j, carry):
        j0 = pl.multiple_of(j * chunk, chunk)
        d = dist_ref[:, pl.ds(j0, chunk)]                    # (8, CH)
        r, prefactor = _scaled_dist_and_prefactor(
            d, inv_cutoff=inv_cutoff, norm_const=norm_const,
            apply_smooth=apply_smooth, p=p, a=a, b=b, c=c)
        for k in range(num_radial):                          # static unroll
            out_ref[k, :, pl.ds(j0, chunk)] = (
                prefactor * jnp.sin(freq_ref[k] * r)).astype(out_ref.dtype)
        return carry

    lax.fori_loop(0, n_chunks, body, jnp.int32(0))


def radial_bessel_function(dist, frequencies, *, cutoff=5.0, smooth_cutoff=5,
                           use_harmonic=None, block_distances=32768,
                           chunk_lanes=512, out_dtype=jnp.float32,
                           min_grid_steps=2, lane_major_output=False):
    """Pallas equivalent of RadialBesselFunction.forward(dist).

    dist:        [n] float distances
    frequencies: [num_radial] float
    returns:     [n, num_radial] (default) or [num_radial, n] if
                 lane_major_output=True (lane-dense, avoids the transpose).
    """
    dist = jnp.asarray(dist).reshape(-1)
    n = int(dist.shape[0])
    num_radial = int(frequencies.shape[0])

    inv_cutoff = 1.0 / cutoff
    norm_const = (2.0 * inv_cutoff) ** 0.5
    apply_smooth = smooth_cutoff is not None and float(smooth_cutoff) != 0.0
    p = float(smooth_cutoff) if apply_smooth else 0.0
    a = -(p + 1.0) * (p + 2.0) / 2.0
    b = p * (p + 2.0)
    c = -p * (p + 1.0) / 2.0

    # ---- tiling: distances packed sublane-dense as (8, n_pad // 8) ----------
    unit = _SUB * _LANE                    # 1024 distances = one (8,128) tile
    step = min(int(block_distances), _round_up(max(n, 1), unit))
    step = max(unit, _round_up(step, unit))
    if n >= unit * min_grid_steps:
        # Keep at least `min_grid_steps` grid steps so a 2-TensorCore chip
        # (v7x) can shard the "parallel" axis; free on 1-TC chips.
        step = min(step, _round_up(_cdiv(n, min_grid_steps), unit))
    n_pad = _round_up(max(n, 1), step)
    grid = (n_pad // step,)
    tl = step // _SUB                      # lanes per grid step (packed layout)
    cols = n_pad // _SUB

    # Per-chunk lane width inside the kernel (caps vreg live ranges).
    chunk = min(int(chunk_lanes), tl)
    chunk = max(_LANE, (chunk // _LANE) * _LANE)
    while tl % chunk:
        chunk -= _LANE

    dist_packed = jnp.pad(dist.astype(jnp.float32), (0, n_pad - n),
                          constant_values=1.0).reshape(_SUB, cols)

    # Fast harmonic path: explicit flag, or trace-time detection on concrete
    # frequency arrays (tracers fall back to the general kernel).
    if use_harmonic is None:
        try:
            freqs_np = np.asarray(frequencies, dtype=np.float32)
            default_np = np.float32(np.pi) * np.arange(1, num_radial + 1,
                                                       dtype=np.float32)
            use_harmonic = bool(np.allclose(freqs_np, default_np,
                                            rtol=1e-6, atol=0.0))
        except Exception:
            use_harmonic = False

    out_shape = jax.ShapeDtypeStruct((num_radial, _SUB, cols), out_dtype)
    out_bytes = num_radial * n_pad * jnp.dtype(out_dtype).itemsize
    dist_spec = pl.BlockSpec((_SUB, tl), lambda i: (0, i))
    out_spec = pl.BlockSpec((num_radial, _SUB, tl), lambda i: (0, 0, i))
    cparams = pltpu.CompilerParams(dimension_semantics=("parallel",))
    common = dict(num_radial=num_radial, chunk=chunk, inv_cutoff=inv_cutoff,
                  norm_const=norm_const, apply_smooth=apply_smooth,
                  p=p, a=a, b=b, c=c)

    if use_harmonic:
        kernel = functools.partial(_rbf_kernel_harmonic, **common)
        cost = pl.CostEstimate(flops=n_pad * (14 + 4 * num_radial),
                               transcendentals=2 * n_pad,
                               bytes_accessed=4 * n_pad + out_bytes)
        out_packed = pl.pallas_call(
            kernel,
            out_shape=out_shape,
            grid=grid,
            in_specs=[dist_spec],
            out_specs=out_spec,
            compiler_params=cparams,
            cost_estimate=cost,
        )(dist_packed)
    else:
        kernel = functools.partial(_rbf_kernel_general, **common)
        cost = pl.CostEstimate(flops=n_pad * (14 + 3 * num_radial),
                               transcendentals=num_radial * n_pad,
                               bytes_accessed=4 * n_pad + out_bytes)
        freqs_f32 = frequencies.astype(jnp.float32).reshape(num_radial)
        out_packed = pl.pallas_call(
            kernel,
            out_shape=out_shape,
            grid=grid,
            in_specs=[dist_spec,
                      pl.BlockSpec(memory_space=pltpu.MemorySpace.SMEM)],
            out_specs=out_spec,
            compiler_params=cparams,
            cost_estimate=cost,
        )(dist_packed, freqs_f32)

    # (R, 8, cols) -> (R, n_pad) is a contiguous (free) reshape; slice the pad.
    out_flat = out_packed.reshape(num_radial, n_pad)[:, :n]   # (R, n) lane-dense
    if lane_major_output:
        return out_flat
    return out_flat.T                                          # reference [n, R]


def _reference_jax(dist, frequencies, cutoff=5.0, smooth_cutoff=5):
    """Plain-JAX reference translated line-by-line from the PyTorch module."""
    inv_cutoff = 1.0 / cutoff
    norm_const = (2.0 * inv_cutoff) ** 0.5
    d = dist[:, None].astype(jnp.float32)
    d_scaled = d * inv_cutoff
    out = norm_const * jnp.sin(frequencies[None, :] * d_scaled) / d
    if smooth_cutoff is not None:
        p = float(smooth_cutoff)
        if p != 0.0:
            a = -(p + 1.0) * (p + 2.0) / 2.0
            b = p * (p + 2.0)
            c = -p * (p + 1.0) / 2.0
            r = d_scaled
            env = 1.0 + a * r ** p + b * r ** (p + 1.0) + c * r ** (p + 2.0)
            smooth = jnp.where(r < 1.0, env, jnp.zeros_like(r))
        else:
            smooth = jnp.ones_like(d)
        out = smooth * out
    return out


if __name__ == "__main__":
    num_radial = 9
    cutoff = 5.0
    smooth_cutoff = 5

    # Default (non-learnable) frequencies, exactly as the module __init__.
    frequencies = pi * jnp.arange(1, num_radial + 1, dtype=jnp.float32)

    key = jax.random.PRNGKey(0)
    n = 200
    dist = jax.random.uniform(key, (n,), dtype=jnp.float32,
                              minval=0.1, maxval=cutoff * 1.2)

    # Path 1: default frequencies -> harmonic (sin-recurrence) kernel.
    out = jax.block_until_ready(
        radial_bessel_function(dist, frequencies, cutoff=cutoff,
                               smooth_cutoff=smooth_cutoff, use_harmonic=True))
    ref = _reference_jax(dist, frequencies, cutoff=cutoff,
                         smooth_cutoff=smooth_cutoff)
    assert out.shape == (n, num_radial)
    assert jnp.allclose(out, ref, atol=2e-5, rtol=1e-4), \
        float(jnp.max(jnp.abs(out - ref)))

    # Path 2: non-default ("learnable") frequencies -> general kernel.
    freqs2 = frequencies * 1.03 + 0.1
    out2 = jax.block_until_ready(
        radial_bessel_function(dist, freqs2, cutoff=cutoff,
                               smooth_cutoff=smooth_cutoff))
    ref2 = _reference_jax(dist, freqs2, cutoff=cutoff,
                          smooth_cutoff=smooth_cutoff)
    assert out2.shape == (n, num_radial)
    assert jnp.allclose(out2, ref2, atol=2e-5, rtol=1e-4), \
        float(jnp.max(jnp.abs(out2 - ref2)))

    # Path 3: larger n -> exercises multi-step grid + in-kernel chunk loop.
    n3 = 9000
    dist3 = jax.random.uniform(jax.random.PRNGKey(1), (n3,), dtype=jnp.float32,
                               minval=0.1, maxval=cutoff * 1.2)
    out3 = jax.block_until_ready(
        radial_bessel_function(dist3, frequencies, cutoff=cutoff,
                               smooth_cutoff=smooth_cutoff))
    ref3 = _reference_jax(dist3, frequencies, cutoff=cutoff,
                          smooth_cutoff=smooth_cutoff)
    assert out3.shape == (n3, num_radial)
    assert jnp.allclose(out3, ref3, atol=2e-5, rtol=1e-4), \
        float(jnp.max(jnp.abs(out3 - ref3)))

    print("KERNEL_OK")
</pallas_src>

<mosaic_0001>
module attributes {stable_mosaic.version = 11 : i64} {
  func.func @_rbf_kernel_harmonic(%arg0: i32, %arg1: memref<8x128xf32, #tpu.memory_space<vmem>>, %arg2: memref<9x8x128xf32, #tpu.memory_space<vmem>>) attributes {dimension_semantics = [#tpu.dimension_semantics<parallel>], iteration_bounds = array<i64: 1>, scalar_prefetch = 0 : i64, scratch_operands = 0 : i64, tpu.core_type = #tpu.core_type<tc>, window_params = [{transform_indices = @transform_0, window_bounds = array<i64: 8, 128>}, {transform_indices = @transform_1, window_bounds = array<i64: 9, 8, 128>}]} {
    %c0_i32 = arith.constant 0 : i32
    %c128_i32 = arith.constant 128 : i32
    %0 = arith.muli %c0_i32, %c128_i32 : i32
    %1 = tpu.assume_multiple %0, 128 : i32
    %c0 = arith.constant 0 : index
    %2 = arith.index_cast %1 : i32 to index
    %3 = vector.load %arg1[%c0, %2] : memref<8x128xf32, #tpu.memory_space<vmem>>, vector<8x128xf32>
    %cst = arith.constant 2.000000e-01 : f32
    %4 = vector.broadcast %cst : f32 to vector<8x128xf32>
    %5 = arith.mulf %3, %4 : vector<8x128xf32>
    %6 = arith.mulf %5, %5 : vector<8x128xf32>
    %7 = arith.mulf %6, %6 : vector<8x128xf32>
    %8 = arith.mulf %5, %7 : vector<8x128xf32>
    %cst_0 = arith.constant -2.100000e+01 : f32
    %9 = vector.broadcast %cst_0 : f32 to vector<8x128xf32>
    %10 = arith.mulf %9, %8 : vector<8x128xf32>
    %cst_1 = arith.constant 1.000000e+00 : f32
    %11 = vector.broadcast %cst_1 : f32 to vector<8x128xf32>
    %12 = arith.addf %11, %10 : vector<8x128xf32>
    %13 = arith.mulf %8, %5 : vector<8x128xf32>
    %cst_2 = arith.constant 3.500000e+01 : f32
    %14 = vector.broadcast %cst_2 : f32 to vector<8x128xf32>
    %15 = arith.mulf %14, %13 : vector<8x128xf32>
    %16 = arith.addf %12, %15 : vector<8x128xf32>
    %17 = arith.mulf %8, %5 : vector<8x128xf32>
    %18 = arith.mulf %17, %5 : vector<8x128xf32>
    %cst_3 = arith.constant -1.500000e+01 : f32
    %19 = vector.broadcast %cst_3 : f32 to vector<8x128xf32>
    %20 = arith.mulf %19, %18 : vector<8x128xf32>
    %21 = arith.addf %16, %20 : vector<8x128xf32>
    %cst_4 = arith.constant 1.000000e+00 : f32
    %22 = vector.broadcast %cst_4 : f32 to vector<8x128xf32>
    %23 = arith.cmpf olt, %5, %22 : vector<8x128xf32>
    %cst_5 = arith.constant 0.000000e+00 : f32
    %24 = vector.broadcast %cst_5 : f32 to vector<8x128xf32>
    %25 = arith.select %23, %21, %24 : vector<8x128xi1>, vector<8x128xf32>
    %cst_6 = arith.constant 0.632455527 : f32
    %26 = vector.broadcast %cst_6 : f32 to vector<8x128xf32>
    %27 = arith.mulf %26, %25 : vector<8x128xf32>
    %28 = arith.divf %27, %3 : vector<8x128xf32>
    %cst_7 = arith.constant 3.14159274 : f32
    %29 = vector.broadcast %cst_7 : f32 to vector<8x128xf32>
    %30 = arith.mulf %5, %29 : vector<8x128xf32>
    %cst_8 = arith.constant 0.000000e+00 : f32
    %31 = vector.broadcast %cst_8 : f32 to vector<8x128xf32>
    %32 = math.sin %30 : vector<8x128xf32>
    %33 = math.cos %30 : vector<8x128xf32>
    %cst_9 = arith.constant 2.000000e+00 : f32
    %34 = vector.broadcast %cst_9 : f32 to vector<8x128xf32>
    %35 = arith.mulf %34, %33 : vector<8x128xf32>
    %36 = arith.mulf %28, %32 : vector<8x128xf32>
    %c0_10 = arith.constant 0 : index
    %c0_11 = arith.constant 0 : index
    %37 = arith.index_cast %1 : i32 to index
    %38 = vector.load %arg2[%c0_10, %c0_11, %37] : memref<9x8x128xf32, #tpu.memory_space<vmem>>, vector<1x8x128xf32>
    %39 = vector.shape_cast %38 : vector<1x8x128xf32> to vector<8x128xf32>
    %40 = vector.shape_cast %36 : vector<8x128xf32> to vector<1x8x128xf32>
    tpu.vector_store %arg2[%c0_10, %c0_11, %37], %40 {strides = array<i32>} : memref<9x8x128xf32, #tpu.memory_space<vmem>>, vector<1x8x128xf32>,
    %41 = arith.mulf %35, %32 : vector<8x128xf32>
    %42 = arith.subf %41, %31 : vector<8x128xf32>
    %43 = arith.mulf %28, %42 : vector<8x128xf32>
    %c1 = arith.constant 1 : index
    %c0_12 = arith.constant 0 : index
    %44 = arith.index_cast %1 : i32 to index
    %45 = vector.load %arg2[%c1, %c0_12, %44] : memref<9x8x128xf32, #tpu.memory_space<vmem>>, vector<1x8x128xf32>
    %46 = vector.shape_cast %45 : vector<1x8x128xf32> to vector<8x128xf32>
    %47 = vector.shape_cast %43 : vector<8x128xf32> to vector<1x8x128xf32>
    tpu.vector_store %arg2[%c1, %c0_12, %44], %47 {strides = array<i32>} : memref<9x8x128xf32, #tpu.memory_space<vmem>>, vector<1x8x128xf32>,
    %48 = arith.mulf %35, %42 : vector<8x128xf32>
    %49 = arith.subf %48, %32 : vector<8x128xf32>
    %50 = arith.mulf %28, %49 : vector<8x128xf32>
    %c2 = arith.constant 2 : index
    %c0_13 = arith.constant 0 : index
    %51 = arith.index_cast %1 : i32 to index
    %52 = vector.load %arg2[%c2, %c0_13, %51] : memref<9x8x128xf32, #tpu.memory_space<vmem>>, vector<1x8x128xf32>
    %53 = vector.shape_cast %52 : vector<1x8x128xf32> to vector<8x128xf32>
    %54 = vector.shape_cast %50 : vector<8x128xf32> to vector<1x8x128xf32>
    tpu.vector_store %arg2[%c2, %c0_13, %51], %54 {strides = array<i32>} : memref<9x8x128xf32, #tpu.memory_space<vmem>>, vector<1x8x128xf32>,
    %55 = arith.mulf %35, %49 : vector<8x128xf32>
    %56 = arith.subf %55, %42 : vector<8x128xf32>
    %57 = arith.mulf %28, %56 : vector<8x128xf32>
    %c3 = arith.constant 3 : index
    %c0_14 = arith.constant 0 : index
    %58 = arith.index_cast %1 : i32 to index
    %59 = vector.load %arg2[%c3, %c0_14, %58] : memref<9x8x128xf32, #tpu.memory_space<vmem>>, vector<1x8x128xf32>
    %60 = vector.shape_cast %59 : vector<1x8x128xf32> to vector<8x128xf32>
    %61 = vector.shape_cast %57 : vector<8x128xf32> to vector<1x8x128xf32>
    tpu.vector_store %arg2[%c3, %c0_14, %58], %61 {strides = array<i32>} : memref<9x8x128xf32, #tpu.memory_space<vmem>>, vector<1x8x128xf32>,
    %62 = arith.mulf %35, %56 : vector<8x128xf32>
    %63 = arith.subf %62, %49 : vector<8x128xf32>
    %64 = arith.mulf %28, %63 : vector<8x128xf32>
    %c4 = arith.constant 4 : index
    %c0_15 = arith.constant 0 : index
    %65 = arith.index_cast %1 : i32 to index
    %66 = vector.load %arg2[%c4, %c0_15, %65] : memref<9x8x128xf32, #tpu.memory_space<vmem>>, vector<1x8x128xf32>
    %67 = vector.shape_cast %66 : vector<1x8x128xf32> to vector<8x128xf32>
    %68 = vector.shape_cast %64 : vector<8x128xf32> to vector<1x8x128xf32>
    tpu.vector_store %arg2[%c4, %c0_15, %65], %68 {strides = array<i32>} : memref<9x8x128xf32, #tpu.memory_space<vmem>>, vector<1x8x128xf32>,
    %69 = arith.mulf %35, %63 : vector<8x128xf32>
    %70 = arith.subf %69, %56 : vector<8x128xf32>
    %71 = arith.mulf %28, %70 : vector<8x128xf32>
    %c5 = arith.constant 5 : index
    %c0_16 = arith.constant 0 : index
    %72 = arith.index_cast %1 : i32 to index
    %73 = vector.load %arg2[%c5, %c0_16, %72] : memref<9x8x128xf32, #tpu.memory_space<vmem>>, vector<1x8x128xf32>
    %74 = vector.shape_cast %73 : vector<1x8x128xf32> to vector<8x128xf32>
    %75 = vector.shape_cast %71 : vector<8x128xf32> to vector<1x8x128xf32>
    tpu.vector_store %arg2[%c5, %c0_16, %72], %75 {strides = array<i32>} : memref<9x8x128xf32, #tpu.memory_space<vmem>>, vector<1x8x128xf32>,
    %76 = arith.mulf %35, %70 : vector<8x128xf32>
    %77 = arith.subf %76, %63 : vector<8x128xf32>
    %78 = arith.mulf %28, %77 : vector<8x128xf32>
    %c6 = arith.constant 6 : index
    %c0_17 = arith.constant 0 : index
    %79 = arith.index_cast %1 : i32 to index
    %80 = vector.load %arg2[%c6, %c0_17, %79] : memref<9x8x128xf32, #tpu.memory_space<vmem>>, vector<1x8x128xf32>
    %81 = vector.shape_cast %80 : vector<1x8x128xf32> to vector<8x128xf32>
    %82 = vector.shape_cast %78 : vector<8x128xf32> to vector<1x8x128xf32>
    tpu.vector_store %arg2[%c6, %c0_17, %79], %82 {strides = array<i32>} : memref<9x8x128xf32, #tpu.memory_space<vmem>>, vector<1x8x128xf32>,
    %83 = arith.mulf %35, %77 : vector<8x128xf32>
    %84 = arith.subf %83, %70 : vector<8x128xf32>
    %85 = arith.mulf %28, %84 : vector<8x128xf32>
    %c7 = arith.constant 7 : index
    %c0_18 = arith.constant 0 : index
    %86 = arith.index_cast %1 : i32 to index
    %87 = vector.load %arg2[%c7, %c0_18, %86] : memref<9x8x128xf32, #tpu.memory_space<vmem>>, vector<1x8x128xf32>
    %88 = vector.shape_cast %87 : vector<1x8x128xf32> to vector<8x128xf32>
    %89 = vector.shape_cast %85 : vector<8x128xf32> to vector<1x8x128xf32>
    tpu.vector_store %arg2[%c7, %c0_18, %86], %89 {strides = array<i32>} : memref<9x8x128xf32, #tpu.memory_space<vmem>>, vector<1x8x128xf32>,
    %90 = arith.mulf %35, %84 : vector<8x128xf32>
    %91 = arith.subf %90, %77 : vector<8x128xf32>
    %92 = arith.mulf %28, %91 : vector<8x128xf32>
    %c8 = arith.constant 8 : index
    %c0_19 = arith.constant 0 : index
    %93 = arith.index_cast %1 : i32 to index
    %94 = vector.load %arg2[%c8, %c0_19, %93] : memref<9x8x128xf32, #tpu.memory_space<vmem>>, vector<1x8x128xf32>
    %95 = vector.shape_cast %94 : vector<1x8x128xf32> to vector<8x128xf32>
    %96 = vector.shape_cast %92 : vector<8x128xf32> to vector<1x8x128xf32>
    tpu.vector_store %arg2[%c8, %c0_19, %93], %96 {strides = array<i32>} : memref<9x8x128xf32, #tpu.memory_space<vmem>>, vector<1x8x128xf32>,
    %c1_i32 = arith.constant 1 : i32
    return
  }
  func.func @transform_0(%arg0: i32) -> (i32, i32) {
    %c0_i32 = arith.constant 0 : i32
    %c0_i32_0 = arith.constant 0 : i32
    return %c0_i32, %arg0 : i32, i32
  }
  func.func @transform_1(%arg0: i32) -> (i32, i32, i32) {
    %c0_i32 = arith.constant 0 : i32
    %c0_i32_0 = arith.constant 0 : i32
    %c0_i32_1 = arith.constant 0 : i32
    return %c0_i32, %c0_i32_0, %arg0 : i32, i32, i32
  }
}

</mosaic_0001>

<bundles_post_ra>
// kernel: tpu_custom_call.1
= control target key start
LH: loop header
LB: loop body
LE: loop exit
PB: predicated region body
PF: predicated region fallthrough
CT: control target
= control target key end

     0   :  { %6 = vsyncpa [#allocation3], 0  ;;  %s455_s0 = inlined_call_operand.hbm [shape: f32[8,128], index: 0, kind: input, shape index: {}]   ;;  %s456_s1 = inlined_call_operand.hbm [shape: f32[9,8,128], index: 1, kind: output, shape index: {}]  }
   0x1   :  { %7 = vsyncpa [#allocation4], 0  ;;  %s394_s6 = smov [#allocation2]  }
   0x2   :  { %s14_s7 = sshll.u32 %s394_s6, 4  ;;  %s15_s7 = int_to_ptr.vmem [resolvable:$true] %s14_s7 }
   0x3   :  { %s358_s8 = scalar_lea.vmem %s15_s7, 128  ;;  %p363_p1 = scmp.lt.s32.totalorder %s15_s7, %s15_s7 }
   0x4   :  { %p359_p0 = scmp.ne.s32.totalorder %s15_s7, %s358_s8  ;;  %p364_p2 = scmp.lt.s32.totalorder %s358_s8, %s358_s8 }
   0x6   :  { %p365_p3 = por %p364_p2, %p363_p1 }
   0x8   :  { %p366_p4 = pnand %p365_p3, %p359_p0 }
   0xa   :  { %369 = shalt.err (!%p366_p4)
}
   0xb   :  { %17 = dma.hbm_to_vmem [thread:$0]  %s455_s0, 128, %s15_s7, [#allocation3]  }
   0xc   :  { %390 = dma.done.wait [#allocation3], 128  }
   0xd   :  { %391 = vsyncadd [#allocation3], 4294967168  ;;  %v21_v0 = vld [vmem:[#allocation2] sm:$0xff]  ;;  %v395_v28 = vmov 683565275   ;;  %s401_s0 = smov [#allocation5]  }
   0xe   :  { %v22_v1 = vmul.f32 0.2, %v21_v0  ;;  %344 = vrcp.f32 %v21_v0  ;;  %v396_v30 = vmov 2475754826   ;;  %v397_v33 = vmov 2131351028  }
   0xf   :  { %v398_v35 = vmov 2102212464   ;;  %v399_v37 = vmov 920167782   ;;  %v400_v45 = vmov 1326507024  }
  0x10   :  { %v23_v2 = vmul.f32 %v22_v1, %v22_v1  ;;  %v417_v3 = vmul.f32 3.1415927, %v22_v1  ;;  %vm34_vm1 = vcmp.lt.f32.partialorder %v22_v1, 1.0  ;;  %s302_s11 = sshll.u32 %s401_s0, 4  ;;  %s303_s11 = int_to_ptr.vmem [resolvable:$true] %s302_s11 }
  0x11   :  { %s370_s12 = scalar_lea.vmem %s303_s11, 1152  ;;  %p375_p6 = scmp.lt.s32.totalorder %s303_s11, %s303_s11 }
  0x12   :  { %v24_v4 = vmul.f32 %v23_v2, %v23_v2  ;;  %v40_v5 = vand.u32 2147483647, %v417_v3  ;;  %v43_v6 = vand.u32 2139095040, %v417_v3  ;;  %vm42_vm8 = vcmp.lt.s32.totalorder %v417_v3, 0  ;;  %p371_p5 = scmp.ne.s32.totalorder %s303_s11, %s370_s12  ;;  %p376_p7 = scmp.lt.s32.totalorder %s370_s12, %s370_s12 }
  0x14   :  { %v25_v7 = vmul.f32 %v24_v4, %v22_v1  ;;  %v44_v8 = vshrl.u32 %v43_v6, 23  ;;  %v47_v9 = vand.u32 8388607, %v40_v5  ;;  %vm41_vm9 = vcmp.le.f32.partialorder %v40_v5, 0.7853982  ;;  %p377_p8 = por %p376_p7, %p375_p6 }
  0x16   :  { %v26_v10 = vmul.f32 -21.0, %v25_v7  ;;  %v28_v11 = vmul.f32 %v25_v7, %v22_v1  ;;  %v322_v12 = vadd.s32 4294967169, %v44_v8  ;;  %v48_v17 = vor.u32 8388608, %v47_v9  ;;  %p378_p9 = pnand %p377_p8, %p371_p5 }
  0x18   :  { %v27_v13 = vadd.f32 1.0, %v26_v10  ;;  %v29_v14 = vmul.f32 35.0, %v28_v11  ;;  %v31_v15 = vmul.f32 %v28_v11, %v22_v1  ;;  %v50_v16 = vadd.s32 1, %v322_v12 }
  0x19   :  { %v88_v24 = vshll.u32 %v48_v17, 8 }
  0x1a   :  { %v30_v18 = vadd.f32 %v29_v14, %v27_v13  ;;  %v32_v19 = vmul.f32 -15.0, %v31_v15  ;;  %vm51_vm0 = vcmp.gt.s32.totalorder %v50_v16, 0 }
  0x1b   :  { %v52_v20 = vsel %vm51_vm0, %v50_v16, 0  ;;  %v345_v25 = vpop.eup %344  ;;  %vm132_vm0 = vweird.f32 %v417_v3 }
  0x1c   :  { %v33_v21 = vadd.f32 %v32_v19, %v30_v18  ;;  %v54_v22 = vand.u32 31, %v52_v20  ;;  %v53_v23 = vshrl.u32 %v52_v20, 5 }
  0x1e   :  { %v35_v26 = vsel %vm34_vm1, %v33_v21, 0.0  ;;  %v55_v27 = vsub.s32 32, %v54_v22  ;;  %v57_v29 = vshll.u32 %v395_v28, %v54_v22  ;;  %v60_v31 = vshll.u32 %v396_v30, %v54_v22 }
  0x1f   :  { %v36_v32 = vmul.f32 0.6324555, %v35_v26  ;;  %v63_v34 = vshll.u32 %v397_v33, %v54_v22  ;;  %v66_v36 = vshll.u32 %v398_v35, %v54_v22  ;;  %v69_v38 = vshll.u32 %v399_v37, %v54_v22 }
  0x20   :  { %v56_v39 = vshrl.u32 %v395_v28, %v55_v27  ;;  %v58_v40 = vshrl.u32 %v396_v30, %v55_v27  ;;  %v61_v41 = vshrl.u32 %v397_v33, %v55_v27  ;;  %v64_v42 = vshrl.u32 %v398_v35, %v55_v27 }
  0x21   :  { %v423_v43 = vmul.f32 %v345_v25, %v36_v32  ;;  %v67_v44 = vshrl.u32 %v399_v37, %v55_v27  ;;  %v70_v46 = vshrl.u32 %v400_v45, %v55_v27  ;;  %vm72_vm2 = vcmp.lt.s32.totalorder %v53_v23, 1 }
  0x22   :  { %v59_v47 = vor.u32 %v58_v40, %v57_v29  ;;  %v62_v48 = vor.u32 %v61_v41, %v60_v31  ;;  %v65_v49 = vor.u32 %v64_v42, %v63_v34  ;;  %vm73_vm3 = vcmp.lt.s32.totalorder %v53_v23, 2 }
  0x23   :  { %v68_v50 = vor.u32 %v67_v44, %v66_v36  ;;  %v71_v51 = vor.u32 %v70_v46, %v69_v38  ;;  %vm74_vm4 = vcmp.lt.s32.totalorder %v53_v23, 3  ;;  %vm75_vm5 = vcmp.lt.s32.totalorder %v53_v23, 4 }
  0x24   :  { %v76_v52 = vsel %vm72_vm2, %v56_v39, %v59_v47  ;;  %v77_v53 = vsel %vm75_vm5, %v65_v49, 2102212464  ;;  %v80_v54 = vsel %vm72_vm2, %v59_v47, %v62_v48  ;;  %v84_v55 = vsel %vm72_vm2, %v62_v48, %v65_v49 }
  0x25   :  { %v78_v56 = vsel %vm74_vm4, %v62_v48, %v77_v53  ;;  %v81_v57 = vsel %vm75_vm5, %v68_v50, 920167782  ;;  %v85_v58 = vsel %vm75_vm5, %v71_v51, 1326507024 }
  0x26   :  { %v82_v59 = vsel %vm74_vm4, %v65_v49, %v81_v57  ;;  %v86_v60 = vsel %vm74_vm4, %v68_v50, %v85_v58  ;;  %v79_v61 = vsel %vm73_vm3, %v76_v52, %v78_v56 }
  0x27   :  { %v83_v62 = vsel %vm73_vm3, %v80_v54, %v82_v59  ;;  %v87_v63 = vsel %vm73_vm3, %v84_v55, %v86_v60  ;;  %v95_v6 = vmul.u32 %v88_v24, %v79_v61 }
  0x28   :  { %v428_v0 = vmul.u32.u64.low %v88_v24, %v87_v63  ;;  %v429_v1 = vmul.u32.u64.high %v88_v24, %v87_v63, %v428_v0  ;;  %v431_v2 = vmul.u32.u64.low %v88_v24, %v83_v62  ;;  %v432_v4 = vmul.u32.u64.high %v88_v24, %v83_v62, %v431_v2 }
  0x2a   :  { %vm97_vm6 = vc.u32 %v429_v1, %v431_v2  ;;  %v98_v7 = vadd.s32 1, %v432_v4  ;;  %v96_v18 = vadd.s32 %v431_v2, %v429_v1 }
  0x2c   :  { %v99_v8 = vsel %vm97_vm6, %v98_v7, %v432_v4 }
  0x2d   :  { %v100_v9 = vadd.s32 %v99_v8, %v95_v6 }
  0x2f   :  { %v101_v10 = vadd.s32 536870912, %v100_v9 }
  0x31   :  { %v102_v11 = vshrl.u32 %v101_v10, 30 }
  0x33   :  { %v103_v12 = vshll.u32 %v102_v11, 30  ;;  %v126_v31 = vsub.s32 4, %v102_v11 }
  0x35   :  { %v104_v13 = vsub.s32 %v100_v9, %v103_v12  ;;  %v127_v34 = vsel %vm42_vm8, %v126_v31, %v102_v11 }
  0x36   :  { %v129_v36 = vsel %vm41_vm9, 0, %v127_v34 }
  0x37   :  { %v106_v14 = vsub.s32 0, %v104_v13  ;;  %v133_v37 = vadd.s32 3, %v129_v36  ;;  %v237_v39 = vand.u32 3, %v129_v36 }
  0x39   :  { %v323_v15 = vmin.u32 %v106_v14, %v104_v13  ;;  %v134_v38 = vand.u32 3, %v133_v37  ;;  %vm242_vm11 = vcmp.eq.s32.totalorder %v237_v39, 2  ;;  %vm239_vm13 = vcmp.eq.s32.totalorder %v237_v39, 0 }
  0x3a   :  { %vm238_vm15 = vcmp.lt.s32.totalorder %v237_v39, 2 }
  0x3b   :  { %v108_v16 = vclz %v323_v15  ;;  %vm139_vm10 = vcmp.eq.s32.totalorder %v134_v38, 2  ;;  %vm136_vm12 = vcmp.eq.s32.totalorder %v134_v38, 0  ;;  %vm135_vm14 = vcmp.lt.s32.totalorder %v134_v38, 2 }
  0x3d   :  { %v324_v17 = vadd.s32 4294967294, %v108_v16 }
  0x3f   :  { %vm325_vm7 = vcmp.lt.s32.totalorder %v324_v17, 0 }
  0x40   :  { %v111_v19 = vsel %vm325_vm7, 0, %v324_v17 }
  0x41   :  { %v112_v20 = vsub.s32 32, %v111_v19  ;;  %v113_v21 = vshll.u32 %v104_v13, %v111_v19  ;;  %v116_v22 = vsub.s32 4294967266, %v111_v19 }
  0x43   :  { %v114_v23 = vshrl.u32 %v96_v18, %v112_v20  ;;  %v117_v24 = vadd.s32 127, %v116_v22 }
  0x45   :  { %v115_v25 = vor.u32 %v114_v23, %v113_v21  ;;  %v118_v26 = vshll.u32 %v117_v24, 23 }
  0x47   :  { %v119_v27 = vor.u32 4788187, %v118_v26  ;;  %v122_v28 = vcvt.s32.f32 %v115_v25 }
  0x49   :  { %v120_v29 = vand.u32 2147483647, %v119_v27 }
  0x4b   :  { %v123_v30 = vmul.f32 %v122_v28, %v120_v29 }
  0x4d   :  { %v124_v32 = vxor.u32 2147483648, %v123_v30 }
  0x4f   :  { %v125_v33 = vsel %vm42_vm8, %v124_v32, %v123_v30 }
  0x50   :  { %v128_v35 = vsel %vm41_vm9, %v417_v3, %v125_v33 }
  0x51   :  { %346 = vcosq.f32 %v128_v35 }
  0x52   :  { %348 = vsinq.f32 %v128_v35 }
  0x5e   :  { %v347_v40 = vpop.eup %346 }
  0x5f   :  { %v349_v41 = vpop.eup %348  ;;  %v140_v42 = vxor.u32 2147483648, %v347_v40 }
  0x60   :  { %v137_v5 = vxor.u32 2147483648, %v349_v41 }
  0x61   :  { %v141_v44 = vsel %vm139_vm10, %v140_v42, %v349_v41  ;;  %v244_v45 = vsel %vm242_vm11, %v140_v42, %v349_v41 }
  0x62   :  { %v138_v46 = vsel %vm136_vm12, %v347_v40, %v137_v5  ;;  %v241_v47 = vsel %vm239_vm13, %v347_v40, %v137_v5 }
  0x63   :  { %v142_v48 = vsel %vm135_vm14, %v138_v46, %v141_v44  ;;  %v245_v49 = vsel %vm238_vm15, %v241_v47, %v244_v45 }
  0x64   :  { %v143_v50 = vsel %vm132_vm0, nan, %v142_v48  ;;  %v246_v51 = vsel %vm132_vm0, nan, %v245_v49 }
  0x65   :  { %v247_v52 = vmul.f32 2.0, %v246_v51  ;;  %v248_v53 = vmul.f32 %v143_v50, %v423_v43 }
  0x67   :  { %249 = vst [vmem:[#allocation5] sm:$0xff] %v248_v53  ;;  %v250_v54 = vmul.f32 %v247_v52, %v143_v50 }
  0x69   :  { %v251_v55 = vmul.f32 %v250_v54, %v423_v43  ;;  %v255_v56 = vmul.f32 %v250_v54, %v247_v52 }
  0x6b   :  { %254 = vst [vmem:[#allocation5 + $0x8] sm:$0xff] %v251_v55  ;;  %v256_v57 = vsub.f32 %v255_v56, %v143_v50 }
  0x6d   :  { %v257_v3 = vmul.f32 %v256_v57, %v423_v43  ;;  %v261_v58 = vmul.f32 %v256_v57, %v247_v52 }
  0x6f   :  { %260 = vst [vmem:[#allocation5 + $0x10] sm:$0xff] %v257_v3  ;;  %v262_v59 = vsub.f32 %v261_v58, %v250_v54 }
  0x71   :  { %v263_v60 = vmul.f32 %v262_v59, %v423_v43  ;;  %v267_v61 = vmul.f32 %v262_v59, %v247_v52 }
  0x73   :  { %266 = vst [vmem:[#allocation5 + $0x18] sm:$0xff] %v263_v60  ;;  %v268_v62 = vsub.f32 %v267_v61, %v256_v57 }
  0x75   :  { %v269_v63 = vmul.f32 %v268_v62, %v423_v43  ;;  %v273_v0 = vmul.f32 %v268_v62, %v247_v52 }
  0x77   :  { %272 = vst [vmem:[#allocation5 + $0x20] sm:$0xff] %v269_v63  ;;  %v274_v1 = vsub.f32 %v273_v0, %v262_v59 }
  0x79   :  { %v275_v2 = vmul.f32 %v274_v1, %v423_v43  ;;  %v279_v4 = vmul.f32 %v274_v1, %v247_v52 }
  0x7b   :  { %278 = vst [vmem:[#allocation5 + $0x28] sm:$0xff] %v275_v2  ;;  %v280_v6 = vsub.f32 %v279_v4, %v268_v62 }
  0x7d   :  { %v281_v7 = vmul.f32 %v280_v6, %v423_v43  ;;  %v285_v8 = vmul.f32 %v280_v6, %v247_v52 }
  0x7f   :  { %284 = vst [vmem:[#allocation5 + $0x30] sm:$0xff] %v281_v7  ;;  %v286_v9 = vsub.f32 %v285_v8, %v274_v1 }
  0x81   :  { %v287_v10 = vmul.f32 %v286_v9, %v423_v43  ;;  %v291_v11 = vmul.f32 %v286_v9, %v247_v52 }
  0x83   :  { %290 = vst [vmem:[#allocation5 + $0x38] sm:$0xff] %v287_v10  ;;  %v292_v12 = vsub.f32 %v291_v11, %v280_v6 }
  0x85   :  { %v293_v13 = vmul.f32 %v292_v12, %v423_v43 }
  0x87   :  { %296 = vst [vmem:[#allocation5 + $0x40] sm:$0xff] %v293_v13 }
  0x88   :  { %381 = shalt.err (!%p378_p9)
}
  0x89   :  { %s402_s13 = smov 128   ;;  %s403_s14 = smov 8  }
  0x8a   :  { %308 = dma.vmem_to_hbm [thread:$0]  %s303_s11, 1152, %s456_s1, [#allocation4], %s402_s13, %s402_s13, %s403_s14  }
  0x8b   :  { %392 = dma.done.wait [#allocation4], 1152  }
  0x8c   :  { %393 = vsyncadd [#allocation4], 4294966144 }
  0x8d   :  { %312 = vsyncpa [#allocation3], 1 }
  0x8e   :  { %313 = vsyncpa [#allocation4], 1 }

</bundles_post_ra>
